<compile_context>
chip_gen: v5e
topology: v5e:2x2
jax: 0.10.0
libtpu: 0.0.40
codegen_flags: <defaults>
</compile_context>

<pallas_src>
import jax
import jax.numpy as jnp
from jax.experimental import pallas as pl
from jax.experimental.pallas import tpu as pltpu

F32 = jnp.float32


# ---------------------------------------------------------------------------
# Pallas kernel: one (batch, N-tile) grid point = one lane-dense matmul + bias
# ---------------------------------------------------------------------------
def _fused_up_kernel(x_ref, w_ref, b_ref, o_ref):
    # x_ref: (1, Cin, Nt)  w_ref: (8*Cout, Cin)  b_ref: (8*Cout, 1)  o_ref: (1, 8*Cout, Nt)
    o_ref[0] = (
        jnp.dot(w_ref[...], x_ref[0], preferred_element_type=F32) + b_ref[...]
    )


def _pick_n_tile(n):
    for t in (1024, 512, 256, 128):
        if n % t == 0:
            return t
    return n  # fall back to a full-extent block (satisfies the (8,128) rule)


# ---------------------------------------------------------------------------
# constant parameter folding:  Wf = W1 @ W11 + W2,  bf = b1 @ W11 + b11 + b2
# ---------------------------------------------------------------------------
def _fuse_params(params):
    w1, w11, w2 = params["w1"], params["w11"], params["w2"]
    cin, cout = w1.shape[0], w1.shape[1]
    w11m = w11.reshape(cout, cout)                       # [c_in_of_conv1_1, c_out]
    w1f = w1.reshape(cin, cout, 8)                       # kernel offsets flattened (8 = 2*2*2)
    w2f = w2.reshape(cin, cout, 8)
    wf = jnp.einsum("icm,co->iom", w1f, w11m) + w2f      # (Cin, Cout, 8)
    bf = params["b1"] @ w11m + params["b11"] + params["b2"]          # (Cout,)
    # kernel LHS rows ordered (co, k):   w_lhs[co*8 + k, ci] = wf[ci, co, k]
    w_lhs = wf.transpose(1, 2, 0).reshape(cout * 8, cin).astype(F32)
    b_rows = jnp.repeat(bf, 8).reshape(cout * 8, 1).astype(F32)
    return w_lhs, b_rows


# ---------------------------------------------------------------------------
# forward pass
# ---------------------------------------------------------------------------
def up_residual_conv_block_forward(params, x):
    B, Cin, H, W, D = x.shape
    Cout = params["w1"].shape[1]
    N = H * W * D

    w_lhs, b_rows = _fuse_params(params)
    x_mat = x.reshape(B, Cin, N).astype(F32)             # free reshape, no transpose

    Nt = _pick_n_tile(N)
    grid = (B, N // Nt)

    out_mat = pl.pallas_call(
        _fused_up_kernel,
        out_shape=jax.ShapeDtypeStruct((B, Cout * 8, N), F32),
        grid=grid,
        in_specs=[
            pl.BlockSpec((1, Cin, Nt), lambda b, n: (b, 0, n)),
            pl.BlockSpec((Cout * 8, Cin), lambda b, n: (0, 0)),
            pl.BlockSpec((Cout * 8, 1), lambda b, n: (0, 0)),
        ],
        out_specs=pl.BlockSpec((1, Cout * 8, Nt), lambda b, n: (b, 0, n)),
        compiler_params=pltpu.CompilerParams(
            dimension_semantics=("parallel", "parallel"),
            vmem_limit_bytes=32 * 1024 * 1024,
        ),
    )(x_mat, w_lhs, b_rows)

    # (B, Cout*8, N) -> (B, Cout, 2,2,2, H, W, D) -> (B, Cout, H,2, W,2, D,2) -> NCDHW
    y = out_mat.reshape(B, Cout, 2, 2, 2, H, W, D)
    y = y.transpose(0, 1, 5, 2, 6, 3, 7, 4)
    return y.reshape(B, Cout, 2 * H, 2 * W, 2 * D)


# ---------------------------------------------------------------------------
# pure-JAX reference (direct transposed-conv math) for a correctness check
# ---------------------------------------------------------------------------
def _convT_k2s2_ref(x, w, b):
    B, Ci, H, W, D = x.shape
    Co = w.shape[1]
    y = jnp.einsum("bihwd,iojkl->bohjwkdl", x, w)        # (B, Co, H,2, W,2, D,2)
    y = y.reshape(B, Co, 2 * H, 2 * W, 2 * D)
    return y + b[None, :, None, None, None]


def _ref_forward(params, x):
    Cout = params["w1"].shape[1]
    out1 = _convT_k2s2_ref(x, params["w1"], params["b1"])
    w11m = params["w11"].reshape(Cout, Cout)
    out1 = (jnp.einsum("bchwd,co->bohwd", out1, w11m)
            + params["b11"][None, :, None, None, None])
    out2 = _convT_k2s2_ref(x, params["w2"], params["b2"])
    return out1 + out2


# ---------------------------------------------------------------------------
# deterministic synthetic parameters (PyTorch ConvTranspose3d weight layout:
# (in_channels, out_channels, kT, kH, kW))
# ---------------------------------------------------------------------------
def init_params(key, in_ch, out_ch):
    ks = jax.random.split(key, 6)
    s = 0.1
    return {
        "w1": jax.random.normal(ks[0], (in_ch, out_ch, 2, 2, 2), F32) * s,
        "b1": jax.random.normal(ks[1], (out_ch,), F32) * s,
        "w11": jax.random.normal(ks[2], (out_ch, out_ch, 1, 1, 1), F32) * s,
        "b11": jax.random.normal(ks[3], (out_ch,), F32) * s,
        "w2": jax.random.normal(ks[4], (in_ch, out_ch, 2, 2, 2), F32) * s,
        "b2": jax.random.normal(ks[5], (out_ch,), F32) * s,
    }


if __name__ == "__main__":
    key = jax.random.PRNGKey(0)
    kp, kx = jax.random.split(key)

    # module defaults: in_channels=16, out_channels=32; small spatial 8^3 -> 16^3
    B, Cin, Cout = 2, 16, 32
    H = W = D = 8

    params = init_params(kp, Cin, Cout)
    x = jax.random.normal(kx, (B, Cin, H, W, D), F32)

    out = up_residual_conv_block_forward(params, x)
    jax.block_until_ready(out)

    assert out.shape == (B, Cout, 2 * H, 2 * W, 2 * D), out.shape
    assert bool(jnp.all(jnp.isfinite(out)))

    ref = _ref_forward(params, x)
    max_err = float(jnp.max(jnp.abs(out - ref)))
    assert max_err < 1e-3, max_err

    print("KERNEL_OK")
</pallas_src>

<mosaic_0001>
module attributes {stable_mosaic.version = 11 : i64} {
  func.func @_fused_up_kernel(%arg0: i32, %arg1: i32, %arg2: memref<1x16x512xf32, #tpu.memory_space<vmem>>, %arg3: memref<256x16xf32, #tpu.memory_space<vmem>>, %arg4: memref<256x1xf32, #tpu.memory_space<vmem>>, %arg5: memref<1x256x512xf32, #tpu.memory_space<vmem>>) attributes {dimension_semantics = [#tpu.dimension_semantics<parallel>, #tpu.dimension_semantics<parallel>], iteration_bounds = array<i64: 2, 1>, scalar_prefetch = 0 : i64, scratch_operands = 0 : i64, tpu.core_type = #tpu.core_type<tc>, window_params = [{transform_indices = @transform_0, window_bounds = array<i64: 1, 16, 512>}, {pipeline_mode = #tpu.pipeline_mode<synchronous>, transform_indices = @transform_1, window_bounds = array<i64: 256, 16>}, {pipeline_mode = #tpu.pipeline_mode<synchronous>, transform_indices = @transform_2, window_bounds = array<i64: 256, 1>}, {transform_indices = @transform_3, window_bounds = array<i64: 1, 256, 512>}]} {
    %c0 = arith.constant 0 : index
    %c0_0 = arith.constant 0 : index
    %0 = vector.load %arg3[%c0, %c0_0] : memref<256x16xf32, #tpu.memory_space<vmem>>, vector<256x16xf32>
    %c0_1 = arith.constant 0 : index
    %c0_2 = arith.constant 0 : index
    %c0_3 = arith.constant 0 : index
    %1 = vector.load %arg2[%c0_1, %c0_2, %c0_3] : memref<1x16x512xf32, #tpu.memory_space<vmem>>, vector<1x16x512xf32>
    %2 = vector.shape_cast %1 : vector<1x16x512xf32> to vector<16x512xf32>
    %cst = arith.constant dense<0.000000e+00> : vector<256x512xf32>
    %3 = tpu.matmul %0, %2, %cst {dimension_numbers = #tpu.dot_dimension_numbers<[1], [0], [0], [1], [0, 0, 1, 1], [], []>} : vector<256x16xf32>, vector<16x512xf32>, vector<256x512xf32> -> vector<256x512xf32>
    %c0_4 = arith.constant 0 : index
    %c0_5 = arith.constant 0 : index
    %4 = vector.load %arg4[%c0_4, %c0_5] : memref<256x1xf32, #tpu.memory_space<vmem>>, vector<256x1xf32>
    %5 = vector.broadcast %4 : vector<256x1xf32> to vector<256x512xf32>
    %6 = arith.addf %3, %5 : vector<256x512xf32>
    %c0_6 = arith.constant 0 : index
    %c0_7 = arith.constant 0 : index
    %c0_8 = arith.constant 0 : index
    %7 = vector.load %arg5[%c0_6, %c0_7, %c0_8] : memref<1x256x512xf32, #tpu.memory_space<vmem>>, vector<1x256x512xf32>
    %8 = vector.shape_cast %7 : vector<1x256x512xf32> to vector<256x512xf32>
    %9 = vector.shape_cast %6 : vector<256x512xf32> to vector<1x256x512xf32>
    tpu.vector_store %arg5[%c0_6, %c0_7, %c0_8], %9 {strides = array<i32>} : memref<1x256x512xf32, #tpu.memory_space<vmem>>, vector<1x256x512xf32>,
    return
  }
  func.func @transform_0(%arg0: i32, %arg1: i32) -> (i32, i32, i32) {
    %c0_i32 = arith.constant 0 : i32
    %c0_i32_0 = arith.constant 0 : i32
    return %arg0, %c0_i32, %arg1 : i32, i32, i32
  }
  func.func @transform_1(%arg0: i32, %arg1: i32) -> (i32, i32) {
    %c0_i32 = arith.constant 0 : i32
    %c0_i32_0 = arith.constant 0 : i32
    %c0_i32_1 = arith.constant 0 : i32
    return %c0_i32, %c0_i32_0 : i32, i32
  }
  func.func @transform_2(%arg0: i32, %arg1: i32) -> (i32, i32) {
    %c0_i32 = arith.constant 0 : i32
    %c0_i32_0 = arith.constant 0 : i32
    %c0_i32_1 = arith.constant 0 : i32
    return %c0_i32, %c0_i32_0 : i32, i32
  }
  func.func @transform_3(%arg0: i32, %arg1: i32) -> (i32, i32, i32) {
    %c0_i32 = arith.constant 0 : i32
    %c0_i32_0 = arith.constant 0 : i32
    return %arg0, %c0_i32, %arg1 : i32, i32, i32
  }
}

</mosaic_0001>

<bundles_post_ra>
// kernel: tpu_custom_call.1
= control target key start
LH: loop header
LB: loop body
LE: loop exit
PB: predicated region body
PF: predicated region fallthrough
CT: control target
= control target key end

     0   :  { %8 = vsyncpa [#allocation3], 0  ;;  %s2065_s0 = inlined_call_operand.vmem [shape: f32[2,16,512], index: 0, kind: input, shape index: {}]   ;;  %s2066_s1 = inlined_call_operand.vmem [shape: f32[256,16], index: 1, kind: input, shape index: {}]   ;;  %s2067_s2 = inlined_call_operand.vmem [shape: f32[256,1], index: 2, kind: input, shape index: {}]   ;;  %s2068_s3 = inlined_call_operand.hbm [shape: f32[2,256,512], index: 3, kind: output, shape index: {}]  }
   0x1   :  { %10 = vsyncpa [#allocation3 + $0x1], 0  ;;  %s1513_s12 = smov 0   ;;  %s1515_s13 = smov 0  }
   0x2   :  { %s1517_s14 = smov 0   ;;  %s1519_s15 = smov 0  }
   0x3   :  { %s1521_s16 = smov 0   ;;  %s1523_s17 = smov 0  }
   0x4 LB: > { %s1206_s18 = sadd.s32 4294967295, %s1488_s17   ;;  %s1207_s19 = sadd.s32 4294967294, %s1488_s17   ;;  %s1488_s17 = sphi %s1523_s17, %s16_s17   ;;  %s1484_s16 = sphi %s1521_s16, %s2075_s16   ;;  %s1480_s15 = sphi %s1519_s15, %s2074_s15   ;;  %s1476_s14 = sphi %s1517_s14, %s2073_s14   ;;  %s1472_s13 = sphi %s1515_s13, %s2072_s13   ;;  %s1468_s12 = sphi %s1513_s12, %s2071_s12  }
   0x5   : > { %s28_s20 = sadd.s32 1, %s1484_s16  ;;  %s107_s21 = sadd.s32 1, %s1476_s14 }
   0x6   : > { %p30_p0 = scmp.ge.s32.totalorder %s28_s20, 2  ;;  %p117_p1 = scmp.ne.s32.totalorder %s1476_s14, %s1472_s13 }
   0x7   : > { %p118_p2 = scmp.eq.s32.totalorder %s1206_s18, 1  ;;  %p123_p3 = scmp.ne.s32.totalorder %s1472_s13, %s1468_s12 }
   0x8   : > { %s2077_s20 = smov (%p30_p0, %s28_s20), 0  ;;  %p124_p5 = scmp.eq.s32.totalorder %s1207_s19, 1 }
   0x9   : > { %p1553_p4 = por %p118_p2, %p117_p1  ;;  %s102_s23 = ssub.s32 %s1484_s16, %s2077_s20 }
   0xa   : > { %p1210_p6 = scmp.ge.s32.totalorder %s1488_s17, 1  ;;  %p105_p7 = scmp.eq.s32.totalorder %s102_s23, 0 }
   0xb   : > { %p1560_p8 = por %p124_p5, %p123_p3  ;;  %p161_p9 = scmp.lt.s32.totalorder %s1488_s17, 3 }
   0xc   : > { %s1566_s25 = scalar_select %p105_p7, %s1476_s14, %s107_s21  }
   0xd   : > { %p162_p10 = pnand %p1210_p6, %p161_p9 }
   0xe   : > { %p190_p11 = scmp.lt.s32.totalorder (!%p162_p10), %s1480_s15, 1  ;;  %s186_s27 = sand.u32 (!%p162_p10), 1, %s1472_s13  }
   0xf   : > { %165 = sbr.rel (%p162_p10) target bundleno = 417 (0x1a1), region = 32  ;;  %s1211_s7 = sshll.u32 (!%p162_p10), %s186_s27, 10 }
  0x10   : > { %s1750_s10 = scalar_lea.vmem (!%p162_p10), [#allocation2], %s1211_s7  ;;  %s1348_s6 = sshll.u32 (!%p162_p10), %s1480_s15, 10 }
  0x11   : > { %s1123_s9 = scalar_lea.hbm (!%p162_p10), %s2068_s3, %s1348_s6  ;;  %s1124_s11 = sshll.u32 (!%p162_p10), %s1750_s10, 4  ;;  %s1125_s11 = int_to_ptr.vmem [resolvable:$true] %s1124_s11 }
  0x12   : > { %s1110_s18 = scalar_lea.sflag (!%p162_p10), [#allocation3], %s186_s27 }
  0x14   : > { %v1490_v0 = vmov 0   ;;  %v240_v1 = vld [vmem:[%s2067_s2] sm:$0xff]  ;;  %s191_s28 = scalar_select %p190_p11, %s1480_s15, 1  ;;  %vm432_vm0 = vcmask 130048   ;;  %v241_v11 = vld [vmem:[%s2067_s2 + $0x8] sm:$0xff]  ;;  %v242_v12 = vld [vmem:[%s2067_s2 + $0x10] sm:$0xff] }
  0x15   : > { %1407 = vset.pattern.permute.xlu0 %v1490_v0  ;;  %1408 = vset.pattern.permute.xlu1 %v1490_v0  ;;  %v200_v10 = vld [vmem:[%s2066_s1] sm:$0xff]  ;;  %v201_v13 = vld [vmem:[%s2066_s1 + $0x8] sm:$0xff]  ;;  %v243_v14 = vld [vmem:[%s2067_s2 + $0x18] sm:$0xff]  ;;  %s1126_s15 = sshll.u32 %s1123_s9, 4  ;;  %s1127_s15 = int_to_ptr.hbm [resolvable:$true] %s1126_s15 }
  0x16   : > { %274 = vperm.xlu0 %1407, %v240_v1   ;;  %1409 = vset.pattern.permute.xlu2 %v1490_v0  ;;  %s1347_s29 = sshll.u32 %s191_s28, 6  ;;  %v202_v15 = vld [vmem:[%s2066_s1 + $0x10] sm:$0xff]  ;;  %v203_v16 = vld [vmem:[%s2066_s1 + $0x18] sm:$0xff]  ;;  %v204_v17 = vld [vmem:[%s2066_s1 + $0x20] sm:$0xff]  ;;  %s1424_s19 = sshra.s32 %s1127_s15, 4  ;;  %s1425_s19 = int_to_ptr.hbm [resolvable:$true] %s1424_s19 }
  0x17   : > { %s197_s5 = scalar_lea.vmem %s2065_s0, %s1347_s29  ;;  %284 = vperm.xlu1 %1408, %v242_v12   ;;  %v246_v18 = vld [vmem:[%s2067_s2 + $0x30] sm:$0xff]  ;;  %v205_v19 = vld [vmem:[%s2066_s1 + $0x28] sm:$0xff]  ;;  %v244_v20 = vld [vmem:[%s2067_s2 + $0x20] sm:$0xff]  ;;  %s1426_s21 = scalar_lea.hbm %s1425_s19, 1024 }
  0x18   : > { %v236_v2 = vld [vmem:[%s197_s5 + $0x20] sm:$0xff]  ;;  %v237_v3 = vld [vmem:[%s197_s5 + $0x28] sm:$0xff]  ;;  %v238_v4 = vld [vmem:[%s197_s5 + $0x30] sm:$0xff]  ;;  %294 = vperm.xlu2 %1409, %v244_v20   ;;  %p1427_p12 = scmp.ne.s32.totalorder %s1425_s19, %s1426_s21  ;;  %s1430_s28 = scalar_lea.hbm %s2068_s3, 2048 }
  0x19   : > { %543 = vmatpush.msra.mxu0 %v236_v2  ;;  %656 = vmatpush.msra.mxu1 %v237_v3  ;;  %v239_v5 = vld [vmem:[%s197_s5 + $0x38] sm:$0xff]  ;;  %v232_v6 = vld [vmem:[%s197_s5] sm:$0xff]  ;;  %v233_v7 = vld [vmem:[%s197_s5 + $0x8] sm:$0xff]  ;;  %p1431_p1 = scmp.lt.s32.totalorder %s1425_s19, %s2068_s3  ;;  %p1432_p2 = scmp.lt.s32.totalorder %s1430_s28, %s1426_s21 }
  0x1a   : > { %769 = vmatpush.msra.mxu2 %v238_v4  ;;  %882 = vmatpush.msra.mxu3 %v239_v5  ;;  %v234_v8 = vld [vmem:[%s197_s5 + $0x10] sm:$0xff]  ;;  %v235_v9 = vld [vmem:[%s197_s5 + $0x18] sm:$0xff]  ;;  %v245_v23 = vld [vmem:[%s2067_s2 + $0x28] sm:$0xff]  ;;  %p1428_p13 = pnand %p1427_p12, %p1553_p4 }
  0x1b   : > { %544 = vmatpush.msra.mxu0 %v232_v6  ;;  %657 = vmatpush.msra.mxu1 %v233_v7  ;;  %v247_v21 = vld [vmem:[%s2067_s2 + $0x38] sm:$0xff]  ;;  %v206_v22 = vld [vmem:[%s2066_s1 + $0x30] sm:$0xff]  ;;  %v249_v25 = vld [vmem:[%s2067_s2 + $0x48] sm:$0xff]  ;;  %p1433_p3 = por %p1432_p2, %p1431_p1 }
  0x1c   : > { %770 = vmatpush.msra.mxu2 %v234_v8  ;;  %883 = vmatpush.msra.mxu3 %v235_v9  ;;  %v207_v24 = vld [vmem:[%s2066_s1 + $0x38] sm:$0xff]  ;;  %v208_v26 = vld [vmem:[%s2066_s1 + $0x40] sm:$0xff]  ;;  %v250_v27 = vld [vmem:[%s2067_s2 + $0x50] sm:$0xff]  ;;  %p1429_p0 = pneg %p1428_p13 }
  0x1d   : > { %1214 = vmatmul.msk.f32.vlgmr.msra.gmra.mxu0 %vm432_vm0, %v200_v10  ;;  %1246 = vmatmul.msk.f32.vlgmr.msra.gmra.mxu1 %vm432_vm0, %v200_v10  ;;  %v209_v28 = vld [vmem:[%s2066_s1 + $0x48] sm:$0xff]  ;;  %v248_v29 = vld [vmem:[%s2067_s2 + $0x40] sm:$0xff]  ;;  %v210_v30 = vld [vmem:[%s2066_s1 + $0x50] sm:$0xff] }
  0x1e   : > { %1278 = vmatmul.msk.f32.vlgmr.msra.gmra.mxu2 %vm432_vm0, %v200_v10  ;;  %1310 = vmatmul.msk.f32.vlgmr.msra.gmra.mxu3 %vm432_vm0, %v200_v10  ;;  %v252_v31 = vld [vmem:[%s2067_s2 + $0x60] sm:$0xff]  ;;  %v211_v32 = vld [vmem:[%s2066_s1 + $0x58] sm:$0xff]  ;;  %v253_v33 = vld [vmem:[%s2067_s2 + $0x68] sm:$0xff]  ;;  %p1434_p5 = pnand %p1433_p3, %p1429_p0 }
  0x1f   : > { %279 = vperm.xlu0 %1407, %v241_v11   ;;  %289 = vperm.xlu1 %1408, %v243_v14   ;;  %v212_v34 = vld [vmem:[%s2066_s1 + $0x60] sm:$0xff]  ;;  %v251_v35 = vld [vmem:[%s2067_s2 + $0x58] sm:$0xff]  ;;  %v213_v36 = vld [vmem:[%s2066_s1 + $0x68] sm:$0xff] }
  0x20   : > { %299 = vperm.xlu2 %1409, %v245_v23   ;;  %v255_v37 = vld [vmem:[%s2067_s2 + $0x78] sm:$0xff]  ;;  %v214_v38 = vld [vmem:[%s2066_s1 + $0x70] sm:$0xff]  ;;  %v256_v39 = vld [vmem:[%s2067_s2 + $0x80] sm:$0xff] }
  0x21   : > { %v215_v40 = vld [vmem:[%s2066_s1 + $0x78] sm:$0xff]  ;;  %v254_v42 = vld [vmem:[%s2067_s2 + $0x70] sm:$0xff]  ;;  %v216_v47 = vld [vmem:[%s2066_s1 + $0x80] sm:$0xff] }
  0x22   : > { %v259_v43 = vld [vmem:[%s2067_s2 + $0x98] sm:$0xff]  ;;  %v258_v44 = vld [vmem:[%s2067_s2 + $0x90] sm:$0xff]  ;;  %v261_v51 = vld [vmem:[%s2067_s2 + $0xa8] sm:$0xff] }
  0x23   : > { %v262_v50 = vld [vmem:[%s2067_s2 + $0xb0] sm:$0xff]  ;;  %v217_v59 = vld [vmem:[%s2066_s1 + $0x88] sm:$0xff]  ;;  %v264_v0 = vld [vmem:[%s2067_s2 + $0xc0] sm:$0xff] }
  0x24   : > { %v265_v63 = vld [vmem:[%s2067_s2 + $0xc8] sm:$0xff]  ;;  %v218_v7 = vld [vmem:[%s2066_s1 + $0x90] sm:$0xff]  ;;  %v268_v11 = vld [vmem:[%s2067_s2 + $0xe0] sm:$0xff] }
  0x25   : > { %1215 = vmatmul.msk.f32.gmra.mxu0 %vm432_vm0, %v201_v13  ;;  %1247 = vmatmul.msk.f32.gmra.mxu1 %vm432_vm0, %v201_v13  ;;  %v257_v10 = vld [vmem:[%s2067_s2 + $0x88] sm:$0xff]  ;;  %v267_v12 = vld [vmem:[%s2067_s2 + $0xd8] sm:$0xff] }
  0x26   : > { %1279 = vmatmul.msk.f32.gmra.mxu2 %vm432_vm0, %v201_v13  ;;  %1311 = vmatmul.msk.f32.gmra.mxu3 %vm432_vm0, %v201_v13  ;;  %v219_v20 = vld [vmem:[%s2066_s1 + $0x98] sm:$0xff] }
  0x27   : > { %304 = vperm.xlu0 %1407, %v246_v18   ;;  %309 = vperm.xlu1 %1408, %v247_v21  }
  0x28   : > { %314 = vperm.xlu2 %1409, %v248_v29  }
  0x2d   : > { %1216 = vmatmul.msk.f32.gmra.mxu0 %vm432_vm0, %v202_v15  ;;  %1248 = vmatmul.msk.f32.gmra.mxu1 %vm432_vm0, %v202_v15 }
  0x2e   : > { %1280 = vmatmul.msk.f32.gmra.mxu2 %vm432_vm0, %v202_v15  ;;  %1312 = vmatmul.msk.f32.gmra.mxu3 %vm432_vm0, %v202_v15 }
  0x2f   : > { %319 = vperm.xlu0 %1407, %v249_v25   ;;  %324 = vperm.xlu1 %1408, %v250_v27   ;;  %v270_v25 = vld [vmem:[%s2067_s2 + $0xf0] sm:$0xff] }
  0x30   : > { %329 = vperm.xlu2 %1409, %v251_v35   ;;  %v260_v35 = vld [vmem:[%s2067_s2 + $0xa0] sm:$0xff] }
  0x35   : > { %1217 = vmatmul.msk.f32.gmra.mxu0 %vm432_vm0, %v203_v16  ;;  %1249 = vmatmul.msk.f32.gmra.mxu1 %vm432_vm0, %v203_v16 }
  0x36   : > { %1281 = vmatmul.msk.f32.gmra.mxu2 %vm432_vm0, %v203_v16  ;;  %1313 = vmatmul.msk.f32.gmra.mxu3 %vm432_vm0, %v203_v16 }
  0x37   : > { %334 = vperm.xlu0 %1407, %v252_v31   ;;  %339 = vperm.xlu1 %1408, %v253_v33  }
  0x38   : > { %344 = vperm.xlu2 %1409, %v254_v42  }
  0x3d   : > { %1218 = vmatmul.msk.f32.gmra.mxu0 %vm432_vm0, %v204_v17  ;;  %1250 = vmatmul.msk.f32.gmra.mxu1 %vm432_vm0, %v204_v17 }
  0x3e   : > { %1282 = vmatmul.msk.f32.gmra.mxu2 %vm432_vm0, %v204_v17  ;;  %1314 = vmatmul.msk.f32.gmra.mxu3 %vm432_vm0, %v204_v17 }
  0x3f   : > { %349 = vperm.xlu0 %1407, %v255_v37   ;;  %354 = vperm.xlu1 %1408, %v256_v39  }
  0x40   : > { %359 = vperm.xlu2 %1409, %v257_v10  }
  0x45   : > { %1219 = vmatmul.msk.f32.gmra.mxu0 %vm432_vm0, %v205_v19  ;;  %1251 = vmatmul.msk.f32.gmra.mxu1 %vm432_vm0, %v205_v19 }
  0x46   : > { %1283 = vmatmul.msk.f32.gmra.mxu2 %vm432_vm0, %v205_v19  ;;  %1315 = vmatmul.msk.f32.gmra.mxu3 %vm432_vm0, %v205_v19 }
  0x47   : > { %369 = vperm.xlu1 %1408, %v259_v43   ;;  %364 = vperm.xlu0 %1407, %v258_v44   ;;  %v221_v43 = vld [vmem:[%s2066_s1 + $0xa8] sm:$0xff] }
  0x48   : > { %374 = vperm.xlu2 %1409, %v260_v35  }
  0x4d   : > { %1220 = vmatmul.msk.f32.gmra.mxu0 %vm432_vm0, %v206_v22  ;;  %1252 = vmatmul.msk.f32.gmra.mxu1 %vm432_vm0, %v206_v22 }
  0x4e   : > { %1284 = vmatmul.msk.f32.gmra.mxu2 %vm432_vm0, %v206_v22  ;;  %1316 = vmatmul.msk.f32.gmra.mxu3 %vm432_vm0, %v206_v22 }
  0x4f   : > { %384 = vperm.xlu1 %1408, %v262_v50   ;;  %379 = vperm.xlu0 %1407, %v261_v51  }
  0x55   : > { %1221 = vmatmul.msk.f32.gmra.mxu0 %vm432_vm0, %v207_v24  ;;  %1253 = vmatmul.msk.f32.gmra.mxu1 %vm432_vm0, %v207_v24 }
  0x56   : > { %1285 = vmatmul.msk.f32.gmra.mxu2 %vm432_vm0, %v207_v24  ;;  %1317 = vmatmul.msk.f32.gmra.mxu3 %vm432_vm0, %v207_v24  ;;  %v271_v24 = vld [vmem:[%s2067_s2 + $0xf8] sm:$0xff] }
  0x57   : > { %399 = vperm.xlu1 %1408, %v265_v63   ;;  %394 = vperm.xlu0 %1407, %v264_v0  }
  0x5d   : > { %1222 = vmatmul.msk.f32.gmra.mxu0 %vm432_vm0, %v208_v26  ;;  %1254 = vmatmul.msk.f32.gmra.mxu1 %vm432_vm0, %v208_v26 }
  0x5e   : > { %1286 = vmatmul.msk.f32.gmra.mxu2 %vm432_vm0, %v208_v26  ;;  %1318 = vmatmul.msk.f32.gmra.mxu3 %vm432_vm0, %v208_v26 }
  0x5f   : > { %414 = vperm.xlu1 %1408, %v268_v11   ;;  %409 = vperm.xlu0 %1407, %v267_v12   ;;  %v224_v12 = vld [vmem:[%s2066_s1 + $0xc0] sm:$0xff] }
  0x65   : > { %1223 = vmatmul.msk.f32.gmra.mxu0 %vm432_vm0, %v209_v28  ;;  %1255 = vmatmul.msk.f32.gmra.mxu1 %vm432_vm0, %v209_v28 }
  0x66   : > { %1287 = vmatmul.msk.f32.gmra.mxu2 %vm432_vm0, %v209_v28  ;;  %1319 = vmatmul.msk.f32.gmra.mxu3 %vm432_vm0, %v209_v28 }
  0x67   : > { %429 = vperm.xlu1 %1408, %v271_v24   ;;  %424 = vperm.xlu0 %1407, %v270_v25  }
  0x6d   : > { %1224 = vmatmul.msk.f32.gmra.mxu0 %vm432_vm0, %v210_v30  ;;  %1256 = vmatmul.msk.f32.gmra.mxu1 %vm432_vm0, %v210_v30 }
  0x6e   : > { %1288 = vmatmul.msk.f32.gmra.mxu2 %vm432_vm0, %v210_v30  ;;  %1320 = vmatmul.msk.f32.gmra.mxu3 %vm432_vm0, %v210_v30 }
  0x72   : > { %v295_v23 = vpop.permute.xlu2 %294 }
  0x75   : > { %1225 = vmatmul.msk.f32.gmra.mxu0 %vm432_vm0, %v211_v32  ;;  %1257 = vmatmul.msk.f32.gmra.mxu1 %vm432_vm0, %v211_v32 }
  0x76   : > { %1289 = vmatmul.msk.f32.gmra.mxu2 %vm432_vm0, %v211_v32  ;;  %1321 = vmatmul.msk.f32.gmra.mxu3 %vm432_vm0, %v211_v32  ;;  %v220_v32 = vld [vmem:[%s2066_s1 + $0xa0] sm:$0xff] }
  0x7d   : > { %1226 = vmatmul.msk.f32.gmra.mxu0 %vm432_vm0, %v212_v34  ;;  %1258 = vmatmul.msk.f32.gmra.mxu1 %vm432_vm0, %v212_v34 }
  0x7e   : > { %1290 = vmatmul.msk.f32.gmra.mxu2 %vm432_vm0, %v212_v34  ;;  %1322 = vmatmul.msk.f32.gmra.mxu3 %vm432_vm0, %v212_v34 }
  0x85   : > { %1227 = vmatmul.msk.f32.gmra.mxu0 %vm432_vm0, %v213_v36  ;;  %1259 = vmatmul.msk.f32.gmra.mxu1 %vm432_vm0, %v213_v36 }
  0x86   : > { %1291 = vmatmul.msk.f32.gmra.mxu2 %vm432_vm0, %v213_v36  ;;  %1323 = vmatmul.msk.f32.gmra.mxu3 %vm432_vm0, %v213_v36  ;;  %v300_v36 = vpop.permute.xlu2 %299 }
  0x88   : > { %v275_v41 = vpop.permute.xlu0 %274 }
  0x89   : > { %v285_v62 = vpop.permute.xlu1 %284 }
  0x8d   : > { %1228 = vmatmul.msk.f32.gmra.mxu0 %vm432_vm0, %v214_v38  ;;  %1260 = vmatmul.msk.f32.gmra.mxu1 %vm432_vm0, %v214_v38 }
  0x8e   : > { %1292 = vmatmul.msk.f32.gmra.mxu2 %vm432_vm0, %v214_v38  ;;  %1324 = vmatmul.msk.f32.gmra.mxu3 %vm432_vm0, %v214_v38 }
  0x91   : > { %v280_v52 = vpop.permute.xlu0 %279  ;;  %v290_v13 = vpop.permute.xlu1 %289 }
  0x95   : > { %1229 = vmatmul.msk.f32.gmra.mxu0 %vm432_vm0, %v215_v40  ;;  %1261 = vmatmul.msk.f32.gmra.mxu1 %vm432_vm0, %v215_v40 }
  0x96   : > { %1293 = vmatmul.msk.f32.gmra.mxu2 %vm432_vm0, %v215_v40  ;;  %1325 = vmatmul.msk.f32.gmra.mxu3 %vm432_vm0, %v215_v40 }
  0x9a   : > { %v546_v45 = vpop.f32.mrf.mxu0  ;;  %v659_v46 = vpop.f32.mrf.mxu1 }
  0x9b   : > { %v547_v48 = vadd.f32 %v546_v45, %v275_v41  ;;  %v660_v49 = vadd.f32 %v659_v46, %v275_v41  ;;  %v263_v46 = vld [vmem:[%s2067_s2 + $0xb8] sm:$0xff] }
  0x9c   : > { %389 = vperm.xlu2 %1409, %v263_v46  }
  0x9d   : > { %1230 = vmatmul.msk.f32.gmra.mxu0 %vm432_vm0, %v216_v47  ;;  %1262 = vmatmul.msk.f32.gmra.mxu1 %vm432_vm0, %v216_v47  ;;  %981 = vst [vmem:[%s1750_s10] sm:$0xff] %v547_v48 }
  0x9e   : > { %1294 = vmatmul.msk.f32.gmra.mxu2 %vm432_vm0, %v216_v47  ;;  %1326 = vmatmul.msk.f32.gmra.mxu3 %vm432_vm0, %v216_v47  ;;  %982 = vst [vmem:[%s1750_s10 + $0x8] sm:$0xff] %v660_v49  ;;  %v305_v47 = vpop.permute.xlu0 %304 }
  0xa1   : > { %v772_v53 = vpop.f32.mrf.mxu2  ;;  %v885_v54 = vpop.f32.mrf.mxu3 }
  0xa2   : > { %v773_v55 = vadd.f32 %v772_v53, %v275_v41  ;;  %v886_v56 = vadd.f32 %v885_v54, %v275_v41  ;;  %v549_v57 = vpop.f32.mrf.mxu0  ;;  %v662_v58 = vpop.f32.mrf.mxu1  ;;  %v222_v54 = vld [vmem:[%s2066_s1 + $0xb0] sm:$0xff] }
  0xa3   : > { %v550_v60 = vadd.f32 %v549_v57, %v280_v52  ;;  %v663_v61 = vadd.f32 %v662_v58, %v280_v52  ;;  %v266_v57 = vld [vmem:[%s2067_s2 + $0xd0] sm:$0xff]  ;;  %v310_v58 = vpop.permute.xlu1 %309 }
  0xa4   : > { %983 = vst [vmem:[%s1750_s10 + $0x10] sm:$0xff] %v773_v55  ;;  %404 = vperm.xlu2 %1409, %v266_v57  }
  0xa5   : > { %984 = vst [vmem:[%s1750_s10 + $0x18] sm:$0xff] %v886_v56  ;;  %1231 = vmatmul.msk.f32.gmra.mxu0 %vm432_vm0, %v217_v59  ;;  %1263 = vmatmul.msk.f32.gmra.mxu1 %vm432_vm0, %v217_v59 }
  0xa6   : > { %1295 = vmatmul.msk.f32.gmra.mxu2 %vm432_vm0, %v217_v59  ;;  %1327 = vmatmul.msk.f32.gmra.mxu3 %vm432_vm0, %v217_v59  ;;  %985 = vst [vmem:[%s1750_s10 + $0x20] sm:$0xff] %v550_v60 }
  0xa7   : > { %986 = vst [vmem:[%s1750_s10 + $0x28] sm:$0xff] %v663_v61 }
  0xa9   : > { %v775_v1 = vpop.f32.mrf.mxu2  ;;  %v888_v2 = vpop.f32.mrf.mxu3 }
  0xaa   : > { %v776_v3 = vadd.f32 %v775_v1, %v280_v52  ;;  %v889_v4 = vadd.f32 %v888_v2, %v280_v52  ;;  %v552_v5 = vpop.f32.mrf.mxu0  ;;  %v665_v6 = vpop.f32.mrf.mxu1  ;;  %v223_v1 = vld [vmem:[%s2066_s1 + $0xb8] sm:$0xff] }
  0xab   : > { %v553_v8 = vadd.f32 %v552_v5, %v285_v62  ;;  %v666_v9 = vadd.f32 %v665_v6, %v285_v62  ;;  %v315_v5 = vpop.permute.xlu2 %314  ;;  %v325_v25 = vpop.permute.xlu1 %324 }
  0xac   : > { %987 = vst [vmem:[%s1750_s10 + $0x30] sm:$0xff] %v776_v3 }
  0xad   : > { %988 = vst [vmem:[%s1750_s10 + $0x38] sm:$0xff] %v889_v4  ;;  %1232 = vmatmul.msk.f32.gmra.mxu0 %vm432_vm0, %v218_v7  ;;  %1264 = vmatmul.msk.f32.gmra.mxu1 %vm432_vm0, %v218_v7  ;;  %v269_v4 = vld [vmem:[%s2067_s2 + $0xe8] sm:$0xff] }
  0xae   : > { %1296 = vmatmul.msk.f32.gmra.mxu2 %vm432_vm0, %v218_v7  ;;  %1328 = vmatmul.msk.f32.gmra.mxu3 %vm432_vm0, %v218_v7  ;;  %989 = vst [vmem:[%s1750_s10 + $0x40] sm:$0xff] %v553_v8 }
  0xaf   : > { %990 = vst [vmem:[%s1750_s10 + $0x48] sm:$0xff] %v666_v9  ;;  %419 = vperm.xlu2 %1409, %v269_v4  }
  0xb1   : > { %v778_v14 = vpop.f32.mrf.mxu2  ;;  %v891_v15 = vpop.f32.mrf.mxu3 }
  0xb2   : > { %v779_v16 = vadd.f32 %v778_v14, %v285_v62  ;;  %v892_v17 = vadd.f32 %v891_v15, %v285_v62  ;;  %v555_v18 = vpop.f32.mrf.mxu0  ;;  %v668_v19 = vpop.f32.mrf.mxu1 }
  0xb3   : > { %v556_v21 = vadd.f32 %v555_v18, %v290_v13  ;;  %v669_v22 = vadd.f32 %v668_v19, %v290_v13  ;;  %v320_v15 = vpop.permute.xlu0 %319  ;;  %v330_v35 = vpop.permute.xlu2 %329 }
  0xb4   : > { %991 = vst [vmem:[%s1750_s10 + $0x50] sm:$0xff] %v779_v16 }
  0xb5   : > { %992 = vst [vmem:[%s1750_s10 + $0x58] sm:$0xff] %v892_v17  ;;  %1233 = vmatmul.msk.f32.gmra.mxu0 %vm432_vm0, %v219_v20  ;;  %1265 = vmatmul.msk.f32.gmra.mxu1 %vm432_vm0, %v219_v20 }
  0xb6   : > { %1297 = vmatmul.msk.f32.gmra.mxu2 %vm432_vm0, %v219_v20  ;;  %1329 = vmatmul.msk.f32.gmra.mxu3 %vm432_vm0, %v219_v20  ;;  %993 = vst [vmem:[%s1750_s10 + $0x60] sm:$0xff] %v556_v21 }
  0xb7   : > { %994 = vst [vmem:[%s1750_s10 + $0x68] sm:$0xff] %v669_v22  ;;  %v225_v22 = vld [vmem:[%s2066_s1 + $0xc8] sm:$0xff] }
  0xb9   : > { %v781_v26 = vpop.f32.mrf.mxu2  ;;  %v894_v27 = vpop.f32.mrf.mxu3 }
  0xba   : > { %v782_v28 = vadd.f32 %v781_v26, %v290_v13  ;;  %v895_v29 = vadd.f32 %v894_v27, %v290_v13  ;;  %v558_v30 = vpop.f32.mrf.mxu0  ;;  %v671_v31 = vpop.f32.mrf.mxu1 }
  0xbb   : > { %v559_v33 = vadd.f32 %v558_v30, %v295_v23  ;;  %v672_v34 = vadd.f32 %v671_v31, %v295_v23 }
  0xbc   : > { %995 = vst [vmem:[%s1750_s10 + $0x70] sm:$0xff] %v782_v28 }
  0xbd   : > { %996 = vst [vmem:[%s1750_s10 + $0x78] sm:$0xff] %v895_v29  ;;  %1234 = vmatmul.msk.f32.gmra.mxu0 %vm432_vm0, %v220_v32  ;;  %1266 = vmatmul.msk.f32.gmra.mxu1 %vm432_vm0, %v220_v32 }
  0xbe   : > { %1298 = vmatmul.msk.f32.gmra.mxu2 %vm432_vm0, %v220_v32  ;;  %1330 = vmatmul.msk.f32.gmra.mxu3 %vm432_vm0, %v220_v32  ;;  %997 = vst [vmem:[%s1750_s10 + $0x80] sm:$0xff] %v559_v33  ;;  %v226_v32 = vld [vmem:[%s2066_s1 + $0xd0] sm:$0xff] }
  0xbf   : > { %998 = vst [vmem:[%s1750_s10 + $0x88] sm:$0xff] %v672_v34 }
  0xc1   : > { %v784_v37 = vpop.f32.mrf.mxu2  ;;  %v897_v38 = vpop.f32.mrf.mxu3 }
  0xc2   : > { %v785_v39 = vadd.f32 %v784_v37, %v295_v23  ;;  %v898_v40 = vadd.f32 %v897_v38, %v295_v23  ;;  %v561_v41 = vpop.f32.mrf.mxu0  ;;  %v674_v42 = vpop.f32.mrf.mxu1 }
  0xc3   : > { %v562_v44 = vadd.f32 %v561_v41, %v300_v36  ;;  %v675_v45 = vadd.f32 %v674_v42, %v300_v36  ;;  %v227_v42 = vld [vmem:[%s2066_s1 + $0xd8] sm:$0xff] }
  0xc4   : > { %999 = vst [vmem:[%s1750_s10 + $0x90] sm:$0xff] %v785_v39 }
  0xc5   : > { %1000 = vst [vmem:[%s1750_s10 + $0x98] sm:$0xff] %v898_v40  ;;  %1235 = vmatmul.msk.f32.gmra.mxu0 %vm432_vm0, %v221_v43  ;;  %1267 = vmatmul.msk.f32.gmra.mxu1 %vm432_vm0, %v221_v43 }
  0xc6   : > { %1299 = vmatmul.msk.f32.gmra.mxu2 %vm432_vm0, %v221_v43  ;;  %1331 = vmatmul.msk.f32.gmra.mxu3 %vm432_vm0, %v221_v43  ;;  %1001 = vst [vmem:[%s1750_s10 + $0xa0] sm:$0xff] %v562_v44 }
  0xc7   : > { %1002 = vst [vmem:[%s1750_s10 + $0xa8] sm:$0xff] %v675_v45  ;;  %v335_v45 = vpop.permute.xlu0 %334 }
  0xc9   : > { %v787_v48 = vpop.f32.mrf.mxu2  ;;  %v900_v49 = vpop.f32.mrf.mxu3 }
  0xca   : > { %v788_v50 = vadd.f32 %v787_v48, %v300_v36  ;;  %v901_v51 = vadd.f32 %v900_v49, %v300_v36  ;;  %v564_v52 = vpop.f32.mrf.mxu0  ;;  %v677_v53 = vpop.f32.mrf.mxu1 }
  0xcb   : > { %v565_v55 = vadd.f32 %v564_v52, %v305_v47  ;;  %v678_v56 = vadd.f32 %v677_v53, %v305_v47  ;;  %v228_v52 = vld [vmem:[%s2066_s1 + $0xe0] sm:$0xff] }
  0xcc   : > { %1003 = vst [vmem:[%s1750_s10 + $0xb0] sm:$0xff] %v788_v50 }
  0xcd   : > { %1004 = vst [vmem:[%s1750_s10 + $0xb8] sm:$0xff] %v901_v51  ;;  %1236 = vmatmul.msk.f32.gmra.mxu0 %vm432_vm0, %v222_v54  ;;  %1268 = vmatmul.msk.f32.gmra.mxu1 %vm432_vm0, %v222_v54 }
  0xce   : > { %1300 = vmatmul.msk.f32.gmra.mxu2 %vm432_vm0, %v222_v54  ;;  %1332 = vmatmul.msk.f32.gmra.mxu3 %vm432_vm0, %v222_v54  ;;  %1005 = vst [vmem:[%s1750_s10 + $0xc0] sm:$0xff] %v565_v55  ;;  %v340_v55 = vpop.permute.xlu1 %339 }
  0xcf   : > { %1006 = vst [vmem:[%s1750_s10 + $0xc8] sm:$0xff] %v678_v56 }
  0xd1   : > { %v790_v59 = vpop.f32.mrf.mxu2  ;;  %v903_v60 = vpop.f32.mrf.mxu3 }
  0xd2   : > { %v791_v61 = vadd.f32 %v790_v59, %v305_v47  ;;  %v904_v62 = vadd.f32 %v903_v60, %v305_v47  ;;  %v567_v63 = vpop.f32.mrf.mxu0  ;;  %v680_v0 = vpop.f32.mrf.mxu1 }
  0xd3   : > { %v568_v2 = vadd.f32 %v567_v63, %v310_v58  ;;  %v681_v3 = vadd.f32 %v680_v0, %v310_v58 }
  0xd4   : > { %1007 = vst [vmem:[%s1750_s10 + $0xd0] sm:$0xff] %v791_v61 }
  0xd5   : > { %1008 = vst [vmem:[%s1750_s10 + $0xd8] sm:$0xff] %v904_v62  ;;  %1237 = vmatmul.msk.f32.gmra.mxu0 %vm432_vm0, %v223_v1  ;;  %1269 = vmatmul.msk.f32.gmra.mxu1 %vm432_vm0, %v223_v1  ;;  %v229_v62 = vld [vmem:[%s2066_s1 + $0xe8] sm:$0xff] }
  0xd6   : > { %1301 = vmatmul.msk.f32.gmra.mxu2 %vm432_vm0, %v223_v1  ;;  %1333 = vmatmul.msk.f32.gmra.mxu3 %vm432_vm0, %v223_v1  ;;  %1009 = vst [vmem:[%s1750_s10 + $0xe0] sm:$0xff] %v568_v2  ;;  %v345_v1 = vpop.permute.xlu2 %344 }
  0xd7   : > { %1010 = vst [vmem:[%s1750_s10 + $0xe8] sm:$0xff] %v681_v3 }
  0xd9   : > { %v793_v6 = vpop.f32.mrf.mxu2  ;;  %v906_v7 = vpop.f32.mrf.mxu3 }
  0xda   : > { %v794_v8 = vadd.f32 %v793_v6, %v310_v58  ;;  %v907_v9 = vadd.f32 %v906_v7, %v310_v58  ;;  %v570_v10 = vpop.f32.mrf.mxu0  ;;  %v683_v11 = vpop.f32.mrf.mxu1 }
  0xdb   : > { %v571_v13 = vadd.f32 %v570_v10, %v315_v5  ;;  %v684_v14 = vadd.f32 %v683_v11, %v315_v5  ;;  %v350_v11 = vpop.permute.xlu0 %349 }
  0xdc   : > { %1011 = vst [vmem:[%s1750_s10 + $0xf0] sm:$0xff] %v794_v8  ;;  %v230_v8 = vld [vmem:[%s2066_s1 + $0xf0] sm:$0xff] }
  0xdd   : > { %1012 = vst [vmem:[%s1750_s10 + $0xf8] sm:$0xff] %v907_v9  ;;  %1238 = vmatmul.msk.f32.gmra.mxu0 %vm432_vm0, %v224_v12  ;;  %1270 = vmatmul.msk.f32.gmra.mxu1 %vm432_vm0, %v224_v12 }
  0xde   : > { %1302 = vmatmul.msk.f32.gmra.mxu2 %vm432_vm0, %v224_v12  ;;  %1334 = vmatmul.msk.f32.gmra.mxu3 %vm432_vm0, %v224_v12  ;;  %1013 = vst [vmem:[%s1750_s10 + $0x100] sm:$0xff] %v571_v13 }
  0xdf   : > { %1014 = vst [vmem:[%s1750_s10 + $0x108] sm:$0xff] %v684_v14 }
  0xe1   : > { %v796_v16 = vpop.f32.mrf.mxu2  ;;  %v909_v17 = vpop.f32.mrf.mxu3 }
  0xe2   : > { %v797_v18 = vadd.f32 %v796_v16, %v315_v5  ;;  %v910_v19 = vadd.f32 %v909_v17, %v315_v5  ;;  %v573_v20 = vpop.f32.mrf.mxu0  ;;  %v686_v21 = vpop.f32.mrf.mxu1 }
  0xe3   : > { %v574_v23 = vadd.f32 %v573_v20, %v320_v15  ;;  %v687_v24 = vadd.f32 %v686_v21, %v320_v15  ;;  %v355_v21 = vpop.permute.xlu1 %354 }
  0xe4   : > { %1015 = vst [vmem:[%s1750_s10 + $0x110] sm:$0xff] %v797_v18  ;;  %v231_v18 = vld [vmem:[%s2066_s1 + $0xf8] sm:$0xff] }
  0xe5   : > { %1016 = vst [vmem:[%s1750_s10 + $0x118] sm:$0xff] %v910_v19  ;;  %1239 = vmatmul.msk.f32.gmra.mxu0 %vm432_vm0, %v225_v22  ;;  %1271 = vmatmul.msk.f32.gmra.mxu1 %vm432_vm0, %v225_v22 }
  0xe6   : > { %1303 = vmatmul.msk.f32.gmra.mxu2 %vm432_vm0, %v225_v22  ;;  %1335 = vmatmul.msk.f32.gmra.mxu3 %vm432_vm0, %v225_v22  ;;  %1017 = vst [vmem:[%s1750_s10 + $0x120] sm:$0xff] %v574_v23 }
  0xe7   : > { %1018 = vst [vmem:[%s1750_s10 + $0x128] sm:$0xff] %v687_v24 }
  0xe9   : > { %v799_v26 = vpop.f32.mrf.mxu2  ;;  %v912_v27 = vpop.f32.mrf.mxu3 }
  0xea   : > { %v800_v28 = vadd.f32 %v799_v26, %v320_v15  ;;  %v913_v29 = vadd.f32 %v912_v27, %v320_v15  ;;  %v576_v30 = vpop.f32.mrf.mxu0  ;;  %v689_v31 = vpop.f32.mrf.mxu1 }
  0xeb   : > { %v577_v33 = vadd.f32 %v576_v30, %v325_v25  ;;  %v690_v34 = vadd.f32 %v689_v31, %v325_v25  ;;  %v360_v30 = vpop.permute.xlu2 %359 }
  0xec   : > { %1019 = vst [vmem:[%s1750_s10 + $0x130] sm:$0xff] %v800_v28 }
  0xed   : > { %1020 = vst [vmem:[%s1750_s10 + $0x138] sm:$0xff] %v913_v29  ;;  %1240 = vmatmul.msk.f32.gmra.mxu0 %vm432_vm0, %v226_v32  ;;  %1272 = vmatmul.msk.f32.gmra.mxu1 %vm432_vm0, %v226_v32 }
  0xee   : > { %1304 = vmatmul.msk.f32.gmra.mxu2 %vm432_vm0, %v226_v32  ;;  %1336 = vmatmul.msk.f32.gmra.mxu3 %vm432_vm0, %v226_v32  ;;  %1021 = vst [vmem:[%s1750_s10 + $0x140] sm:$0xff] %v577_v33 }
  0xef   : > { %1022 = vst [vmem:[%s1750_s10 + $0x148] sm:$0xff] %v690_v34 }
  0xf1   : > { %v802_v36 = vpop.f32.mrf.mxu2  ;;  %v915_v37 = vpop.f32.mrf.mxu3 }
  0xf2   : > { %v803_v38 = vadd.f32 %v802_v36, %v325_v25  ;;  %v916_v39 = vadd.f32 %v915_v37, %v325_v25  ;;  %v579_v40 = vpop.f32.mrf.mxu0  ;;  %v692_v41 = vpop.f32.mrf.mxu1 }
  0xf3   : > { %v580_v43 = vadd.f32 %v579_v40, %v330_v35  ;;  %v693_v44 = vadd.f32 %v692_v41, %v330_v35 }
  0xf4   : > { %1023 = vst [vmem:[%s1750_s10 + $0x150] sm:$0xff] %v803_v38 }
  0xf5   : > { %1024 = vst [vmem:[%s1750_s10 + $0x158] sm:$0xff] %v916_v39  ;;  %1241 = vmatmul.msk.f32.gmra.mxu0 %vm432_vm0, %v227_v42  ;;  %1273 = vmatmul.msk.f32.gmra.mxu1 %vm432_vm0, %v227_v42  ;;  %v365_v39 = vpop.permute.xlu0 %364 }
  0xf6   : > { %1305 = vmatmul.msk.f32.gmra.mxu2 %vm432_vm0, %v227_v42  ;;  %1337 = vmatmul.msk.f32.gmra.mxu3 %vm432_vm0, %v227_v42  ;;  %1025 = vst [vmem:[%s1750_s10 + $0x160] sm:$0xff] %v580_v43 }
  0xf7   : > { %1026 = vst [vmem:[%s1750_s10 + $0x168] sm:$0xff] %v693_v44 }
  0xf9   : > { %v805_v46 = vpop.f32.mrf.mxu2  ;;  %v918_v47 = vpop.f32.mrf.mxu3 }
  0xfa   : > { %v806_v48 = vadd.f32 %v805_v46, %v330_v35  ;;  %v919_v49 = vadd.f32 %v918_v47, %v330_v35  ;;  %v582_v50 = vpop.f32.mrf.mxu0  ;;  %v695_v51 = vpop.f32.mrf.mxu1 }
  0xfb   : > { %v583_v53 = vadd.f32 %v582_v50, %v335_v45  ;;  %v696_v54 = vadd.f32 %v695_v51, %v335_v45 }
  0xfc   : > { %1027 = vst [vmem:[%s1750_s10 + $0x170] sm:$0xff] %v806_v48  ;;  %v370_v48 = vpop.permute.xlu1 %369 }
  0xfd   : > { %1028 = vst [vmem:[%s1750_s10 + $0x178] sm:$0xff] %v919_v49  ;;  %1242 = vmatmul.msk.f32.gmra.mxu0 %vm432_vm0, %v228_v52  ;;  %1274 = vmatmul.msk.f32.gmra.mxu1 %vm432_vm0, %v228_v52 }
  0xfe   : > { %1306 = vmatmul.msk.f32.gmra.mxu2 %vm432_vm0, %v228_v52  ;;  %1338 = vmatmul.msk.f32.gmra.mxu3 %vm432_vm0, %v228_v52  ;;  %1029 = vst [vmem:[%s1750_s10 + $0x180] sm:$0xff] %v583_v53 }
  0xff   : > { %1030 = vst [vmem:[%s1750_s10 + $0x188] sm:$0xff] %v696_v54 }
 0x101   : > { %v808_v56 = vpop.f32.mrf.mxu2  ;;  %v921_v57 = vpop.f32.mrf.mxu3 }
 0x102   : > { %v809_v58 = vadd.f32 %v808_v56, %v335_v45  ;;  %v922_v59 = vadd.f32 %v921_v57, %v335_v45  ;;  %v585_v60 = vpop.f32.mrf.mxu0  ;;  %v698_v61 = vpop.f32.mrf.mxu1 }
 0x103   : > { %v586_v63 = vadd.f32 %v585_v60, %v340_v55  ;;  %v699_v0 = vadd.f32 %v698_v61, %v340_v55  ;;  %v375_v57 = vpop.permute.xlu2 %374 }
 0x104   : > { %1031 = vst [vmem:[%s1750_s10 + $0x190] sm:$0xff] %v809_v58 }
 0x105   : > { %1032 = vst [vmem:[%s1750_s10 + $0x198] sm:$0xff] %v922_v59  ;;  %1243 = vmatmul.msk.f32.gmra.mxu0 %vm432_vm0, %v229_v62  ;;  %1275 = vmatmul.msk.f32.gmra.mxu1 %vm432_vm0, %v229_v62 }
 0x106   : > { %1307 = vmatmul.msk.f32.gmra.mxu2 %vm432_vm0, %v229_v62  ;;  %1339 = vmatmul.msk.f32.gmra.mxu3 %vm432_vm0, %v229_v62  ;;  %1033 = vst [vmem:[%s1750_s10 + $0x1a0] sm:$0xff] %v586_v63 }
 0x107   : > { %1034 = vst [vmem:[%s1750_s10 + $0x1a8] sm:$0xff] %v699_v0 }
 0x109   : > { %v811_v2 = vpop.f32.mrf.mxu2  ;;  %v924_v3 = vpop.f32.mrf.mxu3 }
 0x10a   : > { %v812_v4 = vadd.f32 %v811_v2, %v340_v55  ;;  %v925_v5 = vadd.f32 %v924_v3, %v340_v55  ;;  %v588_v6 = vpop.f32.mrf.mxu0  ;;  %v701_v7 = vpop.f32.mrf.mxu1 }
 0x10b   : > { %v589_v9 = vadd.f32 %v588_v6, %v345_v1  ;;  %v702_v10 = vadd.f32 %v701_v7, %v345_v1  ;;  %v380_v2 = vpop.permute.xlu0 %379 }
 0x10c   : > { %1035 = vst [vmem:[%s1750_s10 + $0x1b0] sm:$0xff] %v812_v4 }
 0x10d   : > { %1036 = vst [vmem:[%s1750_s10 + $0x1b8] sm:$0xff] %v925_v5  ;;  %1244 = vmatmul.msk.f32.gmra.mxu0 %vm432_vm0, %v230_v8  ;;  %1276 = vmatmul.msk.f32.gmra.mxu1 %vm432_vm0, %v230_v8 }
 0x10e   : > { %1308 = vmatmul.msk.f32.gmra.mxu2 %vm432_vm0, %v230_v8  ;;  %1340 = vmatmul.msk.f32.gmra.mxu3 %vm432_vm0, %v230_v8  ;;  %1037 = vst [vmem:[%s1750_s10 + $0x1c0] sm:$0xff] %v589_v9 }
 0x10f   : > { %1038 = vst [vmem:[%s1750_s10 + $0x1c8] sm:$0xff] %v702_v10 }
 0x111   : > { %v814_v12 = vpop.f32.mrf.mxu2  ;;  %v927_v13 = vpop.f32.mrf.mxu3 }
 0x112   : > { %v815_v14 = vadd.f32 %v814_v12, %v345_v1  ;;  %v928_v15 = vadd.f32 %v927_v13, %v345_v1  ;;  %v591_v16 = vpop.f32.mrf.mxu0  ;;  %v704_v17 = vpop.f32.mrf.mxu1 }
 0x113   : > { %v592_v19 = vadd.f32 %v591_v16, %v350_v11  ;;  %v705_v20 = vadd.f32 %v704_v17, %v350_v11 }
 0x114   : > { %1039 = vst [vmem:[%s1750_s10 + $0x1d0] sm:$0xff] %v815_v14 }
 0x115   : > { %1040 = vst [vmem:[%s1750_s10 + $0x1d8] sm:$0xff] %v928_v15  ;;  %1245 = vmatmul.msk.f32.gmra.mxu0 %vm432_vm0, %v231_v18  ;;  %1277 = vmatmul.msk.f32.gmra.mxu1 %vm432_vm0, %v231_v18 }
 0x116   : > { %1309 = vmatmul.msk.f32.gmra.mxu2 %vm432_vm0, %v231_v18  ;;  %1341 = vmatmul.msk.f32.gmra.mxu3 %vm432_vm0, %v231_v18  ;;  %1041 = vst [vmem:[%s1750_s10 + $0x1e0] sm:$0xff] %v592_v19 }
 0x117   : > { %1042 = vst [vmem:[%s1750_s10 + $0x1e8] sm:$0xff] %v705_v20  ;;  %v390_v20 = vpop.permute.xlu2 %389 }
 0x119   : > { %v817_v22 = vpop.f32.mrf.mxu2  ;;  %v930_v23 = vpop.f32.mrf.mxu3 }
 0x11a   : > { %v818_v24 = vadd.f32 %v817_v22, %v350_v11  ;;  %v931_v25 = vadd.f32 %v930_v23, %v350_v11  ;;  %v594_v26 = vpop.f32.mrf.mxu0  ;;  %v707_v27 = vpop.f32.mrf.mxu1 }
 0x11b   : > { %v595_v28 = vadd.f32 %v594_v26, %v355_v21  ;;  %v708_v29 = vadd.f32 %v707_v27, %v355_v21  ;;  %v385_v11 = vpop.permute.xlu1 %384 }
 0x11c   : > { %1043 = vst [vmem:[%s1750_s10 + $0x1f0] sm:$0xff] %v818_v24 }
 0x11d   : > { %1044 = vst [vmem:[%s1750_s10 + $0x1f8] sm:$0xff] %v931_v25 }
 0x11e   : > { %1045 = vst [vmem:[%s1750_s10 + $0x200] sm:$0xff] %v595_v28 }
 0x11f   : > { %1046 = vst [vmem:[%s1750_s10 + $0x208] sm:$0xff] %v708_v29  ;;  %v395_v29 = vpop.permute.xlu0 %394 }
 0x121   : > { %v820_v31 = vpop.f32.mrf.mxu2  ;;  %v933_v32 = vpop.f32.mrf.mxu3 }
 0x122   : > { %v821_v33 = vadd.f32 %v820_v31, %v355_v21  ;;  %v934_v34 = vadd.f32 %v933_v32, %v355_v21  ;;  %v597_v35 = vpop.f32.mrf.mxu0  ;;  %v710_v36 = vpop.f32.mrf.mxu1 }
 0x123   : > { %v598_v37 = vadd.f32 %v597_v35, %v360_v30  ;;  %v711_v38 = vadd.f32 %v710_v36, %v360_v30 }
 0x124   : > { %1047 = vst [vmem:[%s1750_s10 + $0x210] sm:$0xff] %v821_v33 }
 0x125   : > { %1048 = vst [vmem:[%s1750_s10 + $0x218] sm:$0xff] %v934_v34 }
 0x126   : > { %1049 = vst [vmem:[%s1750_s10 + $0x220] sm:$0xff] %v598_v37 }
 0x127   : > { %1050 = vst [vmem:[%s1750_s10 + $0x228] sm:$0xff] %v711_v38  ;;  %v400_v38 = vpop.permute.xlu1 %399 }
 0x129   : > { %v823_v40 = vpop.f32.mrf.mxu2  ;;  %v936_v41 = vpop.f32.mrf.mxu3 }
 0x12a   : > { %v824_v42 = vadd.f32 %v823_v40, %v360_v30  ;;  %v937_v43 = vadd.f32 %v936_v41, %v360_v30  ;;  %v600_v44 = vpop.f32.mrf.mxu0  ;;  %v713_v45 = vpop.f32.mrf.mxu1 }
 0x12b   : > { %v601_v46 = vadd.f32 %v600_v44, %v365_v39  ;;  %v714_v47 = vadd.f32 %v713_v45, %v365_v39 }
 0x12c   : > { %1051 = vst [vmem:[%s1750_s10 + $0x230] sm:$0xff] %v824_v42 }
 0x12d   : > { %1052 = vst [vmem:[%s1750_s10 + $0x238] sm:$0xff] %v937_v43 }
 0x12e   : > { %1053 = vst [vmem:[%s1750_s10 + $0x240] sm:$0xff] %v601_v46 }
 0x12f   : > { %1054 = vst [vmem:[%s1750_s10 + $0x248] sm:$0xff] %v714_v47  ;;  %v405_v47 = vpop.permute.xlu2 %404 }
 0x131   : > { %v826_v49 = vpop.f32.mrf.mxu2  ;;  %v939_v50 = vpop.f32.mrf.mxu3 }
 0x132   : > { %v827_v51 = vadd.f32 %v826_v49, %v365_v39  ;;  %v940_v52 = vadd.f32 %v939_v50, %v365_v39  ;;  %v603_v53 = vpop.f32.mrf.mxu0  ;;  %v716_v54 = vpop.f32.mrf.mxu1 }
 0x133   : > { %v604_v55 = vadd.f32 %v603_v53, %v370_v48  ;;  %v717_v56 = vadd.f32 %v716_v54, %v370_v48 }
 0x134   : > { %1055 = vst [vmem:[%s1750_s10 + $0x250] sm:$0xff] %v827_v51 }
 0x135   : > { %1056 = vst [vmem:[%s1750_s10 + $0x258] sm:$0xff] %v940_v52 }
 0x136   : > { %1057 = vst [vmem:[%s1750_s10 + $0x260] sm:$0xff] %v604_v55 }
 0x137   : > { %1058 = vst [vmem:[%s1750_s10 + $0x268] sm:$0xff] %v717_v56  ;;  %v410_v56 = vpop.permute.xlu0 %409 }
 0x139   : > { %v829_v58 = vpop.f32.mrf.mxu2  ;;  %v942_v59 = vpop.f32.mrf.mxu3 }
 0x13a   : > { %v830_v60 = vadd.f32 %v829_v58, %v370_v48  ;;  %v943_v61 = vadd.f32 %v942_v59, %v370_v48  ;;  %v606_v62 = vpop.f32.mrf.mxu0  ;;  %v719_v63 = vpop.f32.mrf.mxu1 }
 0x13b   : > { %v607_v0 = vadd.f32 %v606_v62, %v375_v57  ;;  %v720_v1 = vadd.f32 %v719_v63, %v375_v57 }
 0x13c   : > { %1059 = vst [vmem:[%s1750_s10 + $0x270] sm:$0xff] %v830_v60 }
 0x13d   : > { %1060 = vst [vmem:[%s1750_s10 + $0x278] sm:$0xff] %v943_v61 }
 0x13e   : > { %1061 = vst [vmem:[%s1750_s10 + $0x280] sm:$0xff] %v607_v0 }
 0x13f   : > { %1062 = vst [vmem:[%s1750_s10 + $0x288] sm:$0xff] %v720_v1  ;;  %v415_v1 = vpop.permute.xlu1 %414 }
 0x141   : > { %v832_v3 = vpop.f32.mrf.mxu2  ;;  %v945_v4 = vpop.f32.mrf.mxu3 }
 0x142   : > { %v833_v5 = vadd.f32 %v832_v3, %v375_v57  ;;  %v946_v6 = vadd.f32 %v945_v4, %v375_v57  ;;  %v609_v7 = vpop.f32.mrf.mxu0  ;;  %v722_v8 = vpop.f32.mrf.mxu1 }
 0x143   : > { %v610_v9 = vadd.f32 %v609_v7, %v380_v2  ;;  %v723_v10 = vadd.f32 %v722_v8, %v380_v2 }
 0x144   : > { %1063 = vst [vmem:[%s1750_s10 + $0x290] sm:$0xff] %v833_v5 }
 0x145   : > { %1064 = vst [vmem:[%s1750_s10 + $0x298] sm:$0xff] %v946_v6 }
 0x146   : > { %1065 = vst [vmem:[%s1750_s10 + $0x2a0] sm:$0xff] %v610_v9 }
 0x147   : > { %1066 = vst [vmem:[%s1750_s10 + $0x2a8] sm:$0xff] %v723_v10  ;;  %v420_v10 = vpop.permute.xlu2 %419 }
 0x149   : > { %v835_v12 = vpop.f32.mrf.mxu2  ;;  %v948_v13 = vpop.f32.mrf.mxu3 }
 0x14a   : > { %v836_v14 = vadd.f32 %v835_v12, %v380_v2  ;;  %v949_v15 = vadd.f32 %v948_v13, %v380_v2  ;;  %v612_v16 = vpop.f32.mrf.mxu0  ;;  %v725_v17 = vpop.f32.mrf.mxu1 }
 0x14b   : > { %v613_v18 = vadd.f32 %v612_v16, %v385_v11  ;;  %v726_v19 = vadd.f32 %v725_v17, %v385_v11 }
 0x14c   : > { %1067 = vst [vmem:[%s1750_s10 + $0x2b0] sm:$0xff] %v836_v14 }
 0x14d   : > { %1068 = vst [vmem:[%s1750_s10 + $0x2b8] sm:$0xff] %v949_v15 }
 0x14e   : > { %1069 = vst [vmem:[%s1750_s10 + $0x2c0] sm:$0xff] %v613_v18 }
 0x14f   : > { %1070 = vst [vmem:[%s1750_s10 + $0x2c8] sm:$0xff] %v726_v19  ;;  %v425_v19 = vpop.permute.xlu0 %424 }
 0x151   : > { %v838_v21 = vpop.f32.mrf.mxu2  ;;  %v951_v22 = vpop.f32.mrf.mxu3 }
 0x152   : > { %v839_v23 = vadd.f32 %v838_v21, %v385_v11  ;;  %v952_v24 = vadd.f32 %v951_v22, %v385_v11  ;;  %v615_v25 = vpop.f32.mrf.mxu0  ;;  %v728_v26 = vpop.f32.mrf.mxu1 }
 0x153   : > { %v616_v27 = vadd.f32 %v615_v25, %v390_v20  ;;  %v729_v28 = vadd.f32 %v728_v26, %v390_v20 }
 0x154   : > { %1071 = vst [vmem:[%s1750_s10 + $0x2d0] sm:$0xff] %v839_v23 }
 0x155   : > { %1072 = vst [vmem:[%s1750_s10 + $0x2d8] sm:$0xff] %v952_v24 }
 0x156   : > { %1073 = vst [vmem:[%s1750_s10 + $0x2e0] sm:$0xff] %v616_v27 }
 0x157   : > { %1074 = vst [vmem:[%s1750_s10 + $0x2e8] sm:$0xff] %v729_v28  ;;  %v430_v28 = vpop.permute.xlu1 %429 }
 0x159   : > { %v841_v30 = vpop.f32.mrf.mxu2  ;;  %v954_v31 = vpop.f32.mrf.mxu3 }
 0x15a   : > { %v842_v32 = vadd.f32 %v841_v30, %v390_v20  ;;  %v955_v33 = vadd.f32 %v954_v31, %v390_v20  ;;  %v618_v34 = vpop.f32.mrf.mxu0  ;;  %v731_v35 = vpop.f32.mrf.mxu1 }
 0x15b   : > { %v619_v36 = vadd.f32 %v618_v34, %v395_v29  ;;  %v732_v37 = vadd.f32 %v731_v35, %v395_v29 }
 0x15c   : > { %1075 = vst [vmem:[%s1750_s10 + $0x2f0] sm:$0xff] %v842_v32 }
 0x15d   : > { %1076 = vst [vmem:[%s1750_s10 + $0x2f8] sm:$0xff] %v955_v33 }
 0x15e   : > { %1077 = vst [vmem:[%s1750_s10 + $0x300] sm:$0xff] %v619_v36 }
 0x15f   : > { %1078 = vst [vmem:[%s1750_s10 + $0x308] sm:$0xff] %v732_v37 }
 0x161   : > { %v844_v39 = vpop.f32.mrf.mxu2  ;;  %v957_v40 = vpop.f32.mrf.mxu3 }
 0x162   : > { %v845_v41 = vadd.f32 %v844_v39, %v395_v29  ;;  %v958_v42 = vadd.f32 %v957_v40, %v395_v29  ;;  %v621_v43 = vpop.f32.mrf.mxu0  ;;  %v734_v44 = vpop.f32.mrf.mxu1 }
 0x163   : > { %v622_v45 = vadd.f32 %v621_v43, %v400_v38  ;;  %v735_v46 = vadd.f32 %v734_v44, %v400_v38 }
 0x164   : > { %1079 = vst [vmem:[%s1750_s10 + $0x310] sm:$0xff] %v845_v41 }
 0x165   : > { %1080 = vst [vmem:[%s1750_s10 + $0x318] sm:$0xff] %v958_v42 }
 0x166   : > { %1081 = vst [vmem:[%s1750_s10 + $0x320] sm:$0xff] %v622_v45 }
 0x167   : > { %1082 = vst [vmem:[%s1750_s10 + $0x328] sm:$0xff] %v735_v46 }
 0x169   : > { %v847_v48 = vpop.f32.mrf.mxu2  ;;  %v960_v49 = vpop.f32.mrf.mxu3 }
 0x16a   : > { %v848_v50 = vadd.f32 %v847_v48, %v400_v38  ;;  %v961_v51 = vadd.f32 %v960_v49, %v400_v38  ;;  %v624_v52 = vpop.f32.mrf.mxu0  ;;  %v737_v53 = vpop.f32.mrf.mxu1 }
 0x16b   : > { %v625_v54 = vadd.f32 %v624_v52, %v405_v47  ;;  %v738_v55 = vadd.f32 %v737_v53, %v405_v47 }
 0x16c   : > { %1083 = vst [vmem:[%s1750_s10 + $0x330] sm:$0xff] %v848_v50 }
 0x16d   : > { %1084 = vst [vmem:[%s1750_s10 + $0x338] sm:$0xff] %v961_v51 }
 0x16e   : > { %1085 = vst [vmem:[%s1750_s10 + $0x340] sm:$0xff] %v625_v54 }
 0x16f   : > { %1086 = vst [vmem:[%s1750_s10 + $0x348] sm:$0xff] %v738_v55 }
 0x171   : > { %v850_v57 = vpop.f32.mrf.mxu2  ;;  %v963_v58 = vpop.f32.mrf.mxu3 }
 0x172   : > { %v851_v59 = vadd.f32 %v850_v57, %v405_v47  ;;  %v964_v60 = vadd.f32 %v963_v58, %v405_v47  ;;  %v627_v61 = vpop.f32.mrf.mxu0  ;;  %v740_v62 = vpop.f32.mrf.mxu1 }
 0x173   : > { %v628_v63 = vadd.f32 %v627_v61, %v410_v56  ;;  %v741_v0 = vadd.f32 %v740_v62, %v410_v56 }
 0x174   : > { %1087 = vst [vmem:[%s1750_s10 + $0x350] sm:$0xff] %v851_v59 }
 0x175   : > { %1088 = vst [vmem:[%s1750_s10 + $0x358] sm:$0xff] %v964_v60 }
 0x176   : > { %1089 = vst [vmem:[%s1750_s10 + $0x360] sm:$0xff] %v628_v63 }
 0x177   : > { %1090 = vst [vmem:[%s1750_s10 + $0x368] sm:$0xff] %v741_v0 }
 0x179   : > { %v853_v2 = vpop.f32.mrf.mxu2  ;;  %v966_v3 = vpop.f32.mrf.mxu3 }
 0x17a   : > { %v854_v4 = vadd.f32 %v853_v2, %v410_v56  ;;  %v967_v5 = vadd.f32 %v966_v3, %v410_v56  ;;  %v630_v6 = vpop.f32.mrf.mxu0  ;;  %v743_v7 = vpop.f32.mrf.mxu1 }
 0x17b   : > { %v631_v8 = vadd.f32 %v630_v6, %v415_v1  ;;  %v744_v9 = vadd.f32 %v743_v7, %v415_v1 }
 0x17c   : > { %1091 = vst [vmem:[%s1750_s10 + $0x370] sm:$0xff] %v854_v4 }
 0x17d   : > { %1092 = vst [vmem:[%s1750_s10 + $0x378] sm:$0xff] %v967_v5 }
 0x17e   : > { %1093 = vst [vmem:[%s1750_s10 + $0x380] sm:$0xff] %v631_v8 }
 0x17f   : > { %1094 = vst [vmem:[%s1750_s10 + $0x388] sm:$0xff] %v744_v9 }
 0x181   : > { %v856_v11 = vpop.f32.mrf.mxu2  ;;  %v969_v12 = vpop.f32.mrf.mxu3 }
 0x182   : > { %v857_v13 = vadd.f32 %v856_v11, %v415_v1  ;;  %v970_v14 = vadd.f32 %v969_v12, %v415_v1  ;;  %v633_v15 = vpop.f32.mrf.mxu0  ;;  %v746_v16 = vpop.f32.mrf.mxu1 }
 0x183   : > { %v634_v17 = vadd.f32 %v633_v15, %v420_v10  ;;  %v747_v18 = vadd.f32 %v746_v16, %v420_v10 }
 0x184   : > { %1095 = vst [vmem:[%s1750_s10 + $0x390] sm:$0xff] %v857_v13 }
 0x185   : > { %1096 = vst [vmem:[%s1750_s10 + $0x398] sm:$0xff] %v970_v14 }
 0x186   : > { %1097 = vst [vmem:[%s1750_s10 + $0x3a0] sm:$0xff] %v634_v17 }
 0x187   : > { %1098 = vst [vmem:[%s1750_s10 + $0x3a8] sm:$0xff] %v747_v18 }
 0x189   : > { %v859_v20 = vpop.f32.mrf.mxu2  ;;  %v972_v21 = vpop.f32.mrf.mxu3 }
 0x18a   : > { %v860_v22 = vadd.f32 %v859_v20, %v420_v10  ;;  %v973_v23 = vadd.f32 %v972_v21, %v420_v10  ;;  %v636_v24 = vpop.f32.mrf.mxu0  ;;  %v749_v25 = vpop.f32.mrf.mxu1 }
 0x18b   : > { %v637_v26 = vadd.f32 %v636_v24, %v425_v19  ;;  %v750_v27 = vadd.f32 %v749_v25, %v425_v19 }
 0x18c   : > { %1099 = vst [vmem:[%s1750_s10 + $0x3b0] sm:$0xff] %v860_v22 }
 0x18d   : > { %1100 = vst [vmem:[%s1750_s10 + $0x3b8] sm:$0xff] %v973_v23 }
 0x18e   : > { %1101 = vst [vmem:[%s1750_s10 + $0x3c0] sm:$0xff] %v637_v26 }
 0x18f   : > { %1102 = vst [vmem:[%s1750_s10 + $0x3c8] sm:$0xff] %v750_v27 }
 0x191   : > { %v862_v29 = vpop.f32.mrf.mxu2  ;;  %v975_v30 = vpop.f32.mrf.mxu3 }
 0x192   : > { %v863_v31 = vadd.f32 %v862_v29, %v425_v19  ;;  %v976_v32 = vadd.f32 %v975_v30, %v425_v19  ;;  %v639_v33 = vpop.f32.mrf.mxu0  ;;  %v752_v34 = vpop.f32.mrf.mxu1 }
 0x193   : > { %v640_v35 = vadd.f32 %v639_v33, %v430_v28  ;;  %v753_v36 = vadd.f32 %v752_v34, %v430_v28 }
 0x194   : > { %1103 = vst [vmem:[%s1750_s10 + $0x3d0] sm:$0xff] %v863_v31 }
 0x195   : > { %1104 = vst [vmem:[%s1750_s10 + $0x3d8] sm:$0xff] %v976_v32 }
 0x196   : > { %1105 = vst [vmem:[%s1750_s10 + $0x3e0] sm:$0xff] %v640_v35 }
 0x197   : > { %1106 = vst [vmem:[%s1750_s10 + $0x3e8] sm:$0xff] %v753_v36 }
 0x199   : > { %v865_v37 = vpop.f32.mrf.mxu2  ;;  %v978_v38 = vpop.f32.mrf.mxu3 }
 0x19a   : > { %v866_v39 = vadd.f32 %v865_v37, %v430_v28  ;;  %v979_v40 = vadd.f32 %v978_v38, %v430_v28 }
 0x19c   : > { %1107 = vst [vmem:[%s1750_s10 + $0x3f0] sm:$0xff] %v866_v39 }
 0x19d   : > { %1108 = vst [vmem:[%s1750_s10 + $0x3f8] sm:$0xff] %v979_v40 }
 0x19e   : > { %1437 = shalt.err (!%p1434_p5)
}
 0x19f   : > { %s1491_s27 = smov 512   ;;  %s1492_s10 = smov 32  }
 0x1a0   : > { %1349 = dma.vmem_to_hbm [thread:$0]  (%p1553_p4), %s1125_s11, 16384, %s1127_s15, %s1110_s18, %s1491_s27, %s1491_s27, %s1492_s10  }
 0x1a1 PF: > { %p1355_p6 = scmp.ge.s32.totalorder %s1488_s17, 2  ;;  %s1141_s4 = sand.u32 1, %s1468_s12  }
 0x1a2   : > { %s1142_s5 = scalar_lea.sflag [#allocation3], %s1141_s4 }
 0x1a3   : > { %p1352_p7 = pnand %p1355_p6, %p1560_p8 }
 0x1a5   : > { %p1353_p9 = pneg %p1352_p7 }
 0x1a7   : > { %1463 = dma.done.wait (%p1353_p9), %s1142_s5, 16384  }
 0x1a8   : > { %1465 = vsyncadd (%p1353_p9), %s1142_s5, 4294950912  ;;  %s16_s17 = sadd.s32 1, %s1488_s17   ;;  %s2071_s12 = smov %s1472_s13 }
 0x1a9   : > { %p13_p10 = scmp.ge.s32.totalorder %s16_s17, 4   ;;  %s2072_s13 = smov %s1476_s14 }
 0x1aa   : > { %s2073_s14 = smov %s1566_s25  ;;  %s2074_s15 = smov %s1484_s16 }
 0x1ab   : > { %s2075_s16 = smov %s2077_s20  ;;  %15 = sbr.rel (!%p13_p10) target bundleno = 4 (0x4), region = 67 }
 0x1b0   :  { %1148 = vsyncpa [#allocation3], 1 }
 0x1b1   :  { %1150 = vsyncpa [#allocation3 + $0x1], 1 }

</bundles_post_ra>
